<compile_context>
chip_gen: v6e
topology: v6e:2x2x1
jax: 0.10.0
libtpu: 0.0.40
codegen_flags: <defaults>
</compile_context>

<pallas_src>
import functools

import jax
import jax.numpy as jnp
from jax import lax
from jax.experimental import pallas as pl
from jax.experimental.pallas import tpu as pltpu


def _cdiv(a: int, b: int) -> int:
    return (a + b - 1) // b


def _round_up(a: int, b: int) -> int:
    return _cdiv(a, b) * b


def _vmem_capacity_bytes() -> int:
    """Physical VMEM of the attached TPU; conservative fallback = v7x 64 MiB."""
    try:
        info = pltpu.get_tpu_info()
        cap = getattr(info, "vmem_capacity_bytes", None)
        if cap:
            return int(cap)
    except Exception:
        pass
    return 64 << 20


def _choose_tm(n: int, tm_cap: int) -> int:
    """Balanced batch tile: exact single tile for small n, otherwise >=2
    (ideally 4+) grid steps so megacore sharding / DMA pipelining kick in."""
    if n <= max(8, min(tm_cap, 128)):
        return n                       # one exact tile (block == full array dim)
    tiles = max(2, _cdiv(n, tm_cap))   # at least 2 steps for v7x's two TCs
    if n >= 4 * 128:
        tiles = max(tiles, 4)          # deeper pipeline when tiles stay >=128 rows
    return _round_up(_cdiv(n, tiles), 8)


def _linear_softplus_kernel(x_ref, w_ref, b_ref, o_ref):
    # x_ref: (TM, n_in)   w_ref: (n_out, n_in)  (torch layout, NOT transposed)
    # b_ref: (1, n_out)   o_ref: (TM, n_out)
    x = x_ref[...]
    w = w_ref[...]

    # Contract last dims of x and w -> (TM, n_out); MXU handles the
    # transposed-RHS contraction natively.  Always accumulate in f32.
    z = lax.dot_general(
        x, w,
        dimension_numbers=(((1,), (1,)), ((), ())),
        preferred_element_type=jnp.float32,
    ) + b_ref[...]

    # Softplus(beta=1000, threshold=20):
    #   out = (1/beta) * log1p(exp(beta*z))  if beta*z <= threshold
    #   out = z                              otherwise (torch linear fallback)
    beta = 1000.0
    threshold = 20.0
    bz = beta * z
    sp = jnp.log1p(jnp.exp(jnp.minimum(bz, threshold))) * (1.0 / beta)
    o_ref[...] = jnp.where(bz > threshold, z, sp).astype(o_ref.dtype)


@functools.partial(jax.jit, static_argnames=("tm", "use_bf16"))
def neural_network_small_forward(x, weight, bias, *, tm: int = 1024,
                                 use_bf16: bool = False):
    """x: (N, ...) any trailing shape; weight: (n_out, n_in) torch layout;
    bias: (n_out,).  Returns (N, n_out) float32."""
    n = x.shape[0]
    x2d = x.reshape(n, -1)             # nn.Flatten(); free for contiguous input
    n_in = x2d.shape[1]
    n_out = weight.shape[0]

    # Streaming dtype (f32 by default; bf16 halves HBM bytes on v6e/v7x).
    in_dtype = jnp.bfloat16 if use_bf16 else x2d.dtype
    if x2d.dtype != in_dtype:
        x2d = x2d.astype(in_dtype)
    if weight.dtype != in_dtype:
        weight = weight.astype(in_dtype)     # pre-cast outside for repeated calls
    b2d = bias.reshape(1, n_out).astype(jnp.float32)   # tiny; effectively free

    # ---- tiling & VMEM policy (generation-aware) ----------------------------
    dsz_in = jnp.dtype(in_dtype).itemsize
    vmem_budget = (_vmem_capacity_bytes() * 3) // 4    # ~48 MiB v7x, ~96 MiB v5e/v6e

    tm_eff = _choose_tm(n, tm)

    def _need(tm_e: int) -> int:
        return (2 * tm_e * n_in * dsz_in       # x tiles, double-buffered
                + 2 * tm_e * n_out * 4         # out tiles, double-buffered
                + 2 * n_out * n_in * dsz_in    # VMEM-resident W (conservative 2x)
                + 2 * n_out * 4)               # bias

    while _need(tm_eff) > vmem_budget and tm_eff > 8:
        tm_eff = max(8, _round_up(tm_eff // 2, 8))

    # Never clamp the limit below what the blocks actually need.
    vmem_limit = max(_need(tm_eff) + (2 << 20), 32 << 20)

    grid = (_cdiv(n, tm_eff),)   # ragged last block handled by Pallas masking

    out = pl.pallas_call(
        _linear_softplus_kernel,
        out_shape=jax.ShapeDtypeStruct((n, n_out), jnp.float32),
        grid=grid,
        in_specs=[
            pl.BlockSpec((tm_eff, n_in), lambda i: (i, 0)),   # x: streamed
            pl.BlockSpec((n_out, n_in), lambda i: (0, 0)),    # W: VMEM-resident
            pl.BlockSpec((1, n_out), lambda i: (0, 0)),       # b: VMEM-resident
        ],
        out_specs=pl.BlockSpec((tm_eff, n_out), lambda i: (i, 0)),
        compiler_params=pltpu.CompilerParams(
            dimension_semantics=("parallel",),   # megacore sharding on v7x
            vmem_limit_bytes=int(vmem_limit),
        ),
    )(x2d, weight, b2d)

    return out


if __name__ == "__main__":
    key = jax.random.PRNGKey(0)
    k_x, k_w, k_b = jax.random.split(key, 3)

    # NCHW input: (batch=2, C=4, H=16, W=16) -> n_in = 1024
    batch, C, H, W = 2, 4, 16, 16
    n_in = C * H * W
    n_out = 32

    x = jax.random.normal(k_x, (batch, C, H, W), dtype=jnp.float32)

    # PyTorch default init: U(-1/sqrt(n_in), 1/sqrt(n_in))
    bound = 1.0 / (n_in ** 0.5)
    weight = jax.random.uniform(k_w, (n_out, n_in), minval=-bound, maxval=bound,
                                dtype=jnp.float32)
    bias = jax.random.uniform(k_b, (n_out,), minval=-bound, maxval=bound,
                              dtype=jnp.float32)

    out = neural_network_small_forward(x, weight, bias)
    out = jax.block_until_ready(out)

    # Plain-JAX reference (same Softplus(beta=1000, threshold=20) semantics).
    z_ref = x.reshape(batch, -1) @ weight.T + bias
    beta, thr = 1000.0, 20.0
    bz = beta * z_ref
    ref = jnp.where(bz > thr, z_ref,
                    jnp.log1p(jnp.exp(jnp.minimum(bz, thr))) / beta)

    assert out.shape == (batch, n_out)
    assert jnp.allclose(out, ref, atol=1e-5, rtol=1e-5)

    print("KERNEL_OK")
</pallas_src>

<mosaic_0001>
module attributes {stable_mosaic.version = 11 : i64} {
  func.func @_linear_softplus_kernel(%arg0: i32, %arg1: memref<2x1024xf32, #tpu.memory_space<vmem>>, %arg2: memref<32x1024xf32, #tpu.memory_space<vmem>>, %arg3: memref<1x32xf32, #tpu.memory_space<vmem>>, %arg4: memref<2x32xf32, #tpu.memory_space<vmem>>) attributes {dimension_semantics = [#tpu.dimension_semantics<parallel>], iteration_bounds = array<i64: 1>, scalar_prefetch = 0 : i64, scratch_operands = 0 : i64, tpu.core_type = #tpu.core_type<tc>, window_params = [{transform_indices = @transform_0, window_bounds = array<i64: 2, 1024>}, {pipeline_mode = #tpu.pipeline_mode<synchronous>, transform_indices = @transform_1, window_bounds = array<i64: 32, 1024>}, {pipeline_mode = #tpu.pipeline_mode<synchronous>, transform_indices = @transform_2, window_bounds = array<i64: 1, 32>}, {transform_indices = @transform_3, window_bounds = array<i64: 2, 32>}]} {
    %c0 = arith.constant 0 : index
    %c0_0 = arith.constant 0 : index
    %0 = vector.load %arg1[%c0, %c0_0] : memref<2x1024xf32, #tpu.memory_space<vmem>>, vector<2x1024xf32>
    %c0_1 = arith.constant 0 : index
    %c0_2 = arith.constant 0 : index
    %1 = vector.load %arg2[%c0_1, %c0_2] : memref<32x1024xf32, #tpu.memory_space<vmem>>, vector<32x1024xf32>
    %cst = arith.constant dense<0.000000e+00> : vector<2x32xf32>
    %2 = tpu.matmul %0, %1, %cst {dimension_numbers = #tpu.dot_dimension_numbers<[1], [1], [0], [0], [0, 0, 1, 0], [], []>} : vector<2x1024xf32>, vector<32x1024xf32>, vector<2x32xf32> -> vector<2x32xf32>
    %c0_3 = arith.constant 0 : index
    %c0_4 = arith.constant 0 : index
    %3 = vector.load %arg3[%c0_3, %c0_4] : memref<1x32xf32, #tpu.memory_space<vmem>>, vector<1x32xf32>
    %4 = vector.broadcast %3 : vector<1x32xf32> to vector<2x32xf32>
    %5 = arith.addf %2, %4 : vector<2x32xf32>
    %cst_5 = arith.constant 1.000000e+03 : f32
    %6 = vector.broadcast %cst_5 : f32 to vector<2x32xf32>
    %7 = arith.mulf %6, %5 : vector<2x32xf32>
    %cst_6 = arith.constant 2.000000e+01 : f32
    %8 = vector.broadcast %cst_6 : f32 to vector<2x32xf32>
    %9 = arith.minimumf %7, %8 : vector<2x32xf32>
    %10 = math.exp %9 : vector<2x32xf32>
    %11 = math.log1p %10 : vector<2x32xf32>
    %cst_7 = arith.constant 1.000000e-03 : f32
    %12 = vector.broadcast %cst_7 : f32 to vector<2x32xf32>
    %13 = arith.mulf %11, %12 : vector<2x32xf32>
    %cst_8 = arith.constant 2.000000e+01 : f32
    %14 = vector.broadcast %cst_8 : f32 to vector<2x32xf32>
    %15 = arith.cmpf ogt, %7, %14 : vector<2x32xf32>
    %16 = arith.select %15, %5, %13 : vector<2x32xi1>, vector<2x32xf32>
    %c0_9 = arith.constant 0 : index
    %c0_10 = arith.constant 0 : index
    %17 = vector.load %arg4[%c0_9, %c0_10] : memref<2x32xf32, #tpu.memory_space<vmem>>, vector<2x32xf32>
    tpu.vector_store %arg4[%c0_9, %c0_10], %16 {strides = array<i32>} : memref<2x32xf32, #tpu.memory_space<vmem>>, vector<2x32xf32>,
    return
  }
  func.func @transform_0(%arg0: i32) -> (i32, i32) {
    %c0_i32 = arith.constant 0 : i32
    %c0_i32_0 = arith.constant 0 : i32
    return %arg0, %c0_i32 : i32, i32
  }
  func.func @transform_1(%arg0: i32) -> (i32, i32) {
    %c0_i32 = arith.constant 0 : i32
    %c0_i32_0 = arith.constant 0 : i32
    %c0_i32_1 = arith.constant 0 : i32
    return %c0_i32, %c0_i32_0 : i32, i32
  }
  func.func @transform_2(%arg0: i32) -> (i32, i32) {
    %c0_i32 = arith.constant 0 : i32
    %c0_i32_0 = arith.constant 0 : i32
    %c0_i32_1 = arith.constant 0 : i32
    return %c0_i32, %c0_i32_0 : i32, i32
  }
  func.func @transform_3(%arg0: i32) -> (i32, i32) {
    %c0_i32 = arith.constant 0 : i32
    %c0_i32_0 = arith.constant 0 : i32
    return %arg0, %c0_i32 : i32, i32
  }
}

</mosaic_0001>

<bundles_post_ra>
// kernel: neural_network_small_forward.1
= control target key start
LH: loop header
LB: loop body
LE: loop exit
PB: predicated region body
PF: predicated region fallthrough
CT: control target
= control target key end

     0   :  { %8 = vsyncpa [#allocation3], 0  ;;  %s523_s0 = inlined_call_operand.vmem [shape: f32[2,1024], index: 0, kind: input, shape index: {}]   ;;  %s524_s1 = inlined_call_operand.hbm [shape: f32[32,1024], index: 1, kind: input, shape index: {}]   ;;  %s525_s2 = inlined_call_operand.vmem [shape: f32[1,32], index: 2, kind: input, shape index: {}]   ;;  %s526_s3 = inlined_call_operand.hbm [shape: f32[2,32], index: 3, kind: output, shape index: {}]  }
   0x1   :  { %9 = vsyncpa [#allocation4], 0  ;;  %s483_s12 = smov [#allocation2]  }
   0x2   :  { %s17_s13 = sshll.u32 %s483_s12, 4  ;;  %s18_s13 = int_to_ptr.vmem [resolvable:$true] %s17_s13 }
   0x3   :  { %s447_s14 = scalar_lea.vmem %s18_s13, 4096  ;;  %p452_p1 = scmp.lt.s32.totalorder %s18_s13, %s18_s13 }
   0x4   :  { %p448_p0 = scmp.ne.s32.totalorder %s18_s13, %s447_s14  ;;  %p453_p2 = scmp.lt.s32.totalorder %s447_s14, %s447_s14 }
   0x6   :  { %p454_p3 = por %p453_p2, %p452_p1 }
   0x8   :  { %p455_p4 = pnand %p454_p3, %p448_p0 }
   0xa   :  { %458 = shalt.err (!%p455_p4)
}
   0xb   :  { %s484_s15 = smov 1024   ;;  %s485_s16 = smov 64  }
   0xc   :  { %23 = dma.hbm_to_vmem [thread:$0]  %s524_s1, 4096, %s18_s13, [#allocation3], %s484_s15, %s484_s15, %s485_s16  }
   0xd   :  { %479 = dma.done.wait [#allocation3], 4096  }
   0xe   :  { %480 = vsyncadd [#allocation3], 4294963200  ;;  %v486_v0 = vmov 1983009808   ;;  %v76_v2 = vlaneseq  ;;  %v56_v5 = vld [vmem:[#allocation2 + $0xc8] sm:$0xff]  ;;  %v58_v6 = vld [vmem:[#allocation2 + $0xd8] sm:$0xff] }
   0xf   :  { %v74_v1 = vunpack.c.l.s4 %v486_v0  ;;  %v55_v7 = vld [vmem:[#allocation2 + $0xc0] sm:$0xff]  ;;  %138 = vmatprep.subr.mxu0 %v56_v5  ;;  %208 = vmatprep.subr.mxu1 %v58_v6  ;;  %v57_v8 = vld [vmem:[#allocation2 + $0xd0] sm:$0xff]  ;;  %v48_v9 = vld [vmem:[#allocation2 + $0x88] sm:$0xff]  ;;  %vm410_vm1 = vcmask 254976  }
  0x10   :  { %v77_v4 = vshrl.u32 %v76_v2, 7  ;;  %v50_v10 = vld [vmem:[#allocation2 + $0x98] sm:$0xff]  ;;  %139 = vmatpush1.xpose.msra.mxu0 %v55_v7  ;;  %209 = vmatpush1.xpose.msra.mxu1 %v57_v8  ;;  %v47_v12 = vld [vmem:[#allocation2 + $0x80] sm:$0xff]  ;;  %v49_v13 = vld [vmem:[#allocation2 + $0x90] sm:$0xff] }
  0x11   :  { %v75_v3 = vunpack.c.0.s8 %v74_v1  ;;  %140 = vmatprep.subr.mxu0 %v48_v9  ;;  %210 = vmatprep.subr.mxu1 %v50_v10  ;;  %v40_v14 = vld [vmem:[#allocation2 + $0x48] sm:$0xff]  ;;  %v42_v15 = vld [vmem:[#allocation2 + $0x58] sm:$0xff]  ;;  %v29_v16 = vld [vmem:[%s523_s0] sm:$0xff] }
  0x12   :  { %v72_v18 = vcombine.high %v29_v16, %v29_v16  ;;  %v39_v19 = vld [vmem:[#allocation2 + $0x40] sm:$0xff]  ;;  %v41_v20 = vld [vmem:[#allocation2 + $0x50] sm:$0xff]  ;;  %v32_v21 = vld [vmem:[#allocation2 + $0x8] sm:$0xff] }
  0x13   :  { %v78_v11 = vsub.s32 %v75_v3, %v77_v4  ;;  %v34_v22 = vld [vmem:[#allocation2 + $0x18] sm:$0xff]  ;;  %v31_v26 = vld [vmem:[#allocation2] sm:$0xff]  ;;  %v33_v27 = vld [vmem:[#allocation2 + $0x10] sm:$0xff] }
  0x14   :  { %141 = vmatpush1.xpose.msra.mxu0 %v47_v12  ;;  %211 = vmatpush1.xpose.msra.mxu1 %v49_v13  ;;  %v30_v28 = vld [vmem:[%s523_s0 + $0x8] sm:$0xff]  ;;  %v62_v30 = vld [vmem:[#allocation2 + $0xf8] sm:$0xff]  ;;  %v59_v34 = vld [vmem:[#allocation2 + $0xe0] sm:$0xff] }
  0x15   :  { %v79_v17 = vrot.slane %v29_v16, %v78_v11  ;;  %142 = vmatprep.subr.mxu0 %v40_v14  ;;  %212 = vmatprep.subr.mxu1 %v42_v15  ;;  %v86_v24 = vrot.slane %v72_v18, %v78_v11  ;;  %v60_v29 = vld [vmem:[#allocation2 + $0xe8] sm:$0xff]  ;;  %v96_v31 = vrot.slane %v30_v28, %v78_v11  ;;  %v61_v35 = vld [vmem:[#allocation2 + $0xf0] sm:$0xff]  ;;  %v54_v37 = vld [vmem:[#allocation2 + $0xb8] sm:$0xff] }
  0x16   :  { %v89_v32 = vcombine.high %v30_v28, %v30_v28  ;;  %v52_v36 = vld [vmem:[#allocation2 + $0xa8] sm:$0xff]  ;;  %v51_v40 = vld [vmem:[#allocation2 + $0xa0] sm:$0xff]  ;;  %v53_v41 = vld [vmem:[#allocation2 + $0xb0] sm:$0xff] }
  0x17   :  { %v87_v23 = vcombine.high %v79_v17, %v79_v17  ;;  %v88_v25 = vcombine.high %v86_v24, %v86_v24  ;;  %v104_v38 = vcombine.high %v96_v31, %v96_v31  ;;  %v44_v42 = vld [vmem:[#allocation2 + $0x68] sm:$0xff]  ;;  %v46_v43 = vld [vmem:[#allocation2 + $0x78] sm:$0xff]  ;;  %v43_v44 = vld [vmem:[#allocation2 + $0x60] sm:$0xff] }
  0x18   :  { %143 = vmatpush1.xpose.msra.mxu0 %v39_v19  ;;  %213 = vmatpush1.xpose.msra.mxu1 %v41_v20  ;;  %v103_v33 = vrot.slane %v89_v32, %v78_v11  ;;  %v45_v45 = vld [vmem:[#allocation2 + $0x70] sm:$0xff]  ;;  %v36_v46 = vld [vmem:[#allocation2 + $0x28] sm:$0xff]  ;;  %v38_v47 = vld [vmem:[#allocation2 + $0x38] sm:$0xff] }
  0x19   :  { %144 = vmatprep.subr.mxu0 %v32_v21  ;;  %214 = vmatprep.subr.mxu1 %v34_v22  ;;  %v35_v48 = vld [vmem:[#allocation2 + $0x20] sm:$0xff]  ;;  %v37_v49 = vld [vmem:[#allocation2 + $0x30] sm:$0xff] }
  0x1a   :  { %178 = vmatprep.mubr.f32.mxu0 %v87_v23  ;;  %248 = vmatprep.mubr.f32.mxu1 %v88_v25  ;;  %v105_v39 = vcombine.high %v103_v33, %v103_v33  ;;  %v427_v54 = vld [vmem:[%s525_s2] ss:$0 sm:$0xff]  ;;  %s487_s2 = smov [#allocation5]  }
  0x1b   :  { %s418_s23 = sshll.u32 %s487_s2, 4  ;;  %s419_s23 = int_to_ptr.vmem [resolvable:$true] %s418_s23 }
  0x1c   :  { %145 = vmatpush1.xpose.msra.mxu0 %v31_v26  ;;  %215 = vmatpush1.xpose.msra.mxu1 %v33_v27  ;;  %s459_s24 = scalar_lea.vmem %s419_s23, 32  ;;  %p464_p6 = scmp.lt.s32.totalorder %s419_s23, %s419_s23 }
  0x1d   :  { %278 = vmatprep.subr.mxu0 %v60_v29  ;;  %348 = vmatprep.subr.mxu1 %v62_v30  ;;  %p460_p5 = scmp.ne.s32.totalorder %s419_s23, %s459_s24  ;;  %p465_p7 = scmp.lt.s32.totalorder %s459_s24, %s459_s24 }
  0x1f   :  { %179 = vmatmul.mubr.f32.vlgmr.msra.gmra.mxu0 %v79_v17  ;;  %249 = vmatmul.mubr.f32.vlgmr.msra.gmra.mxu1 %v86_v24  ;;  %p466_p8 = por %p465_p7, %p464_p6 }
  0x20   :  { %279 = vmatpush1.xpose.msra.mxu0 %v59_v34  ;;  %349 = vmatpush1.xpose.msra.mxu1 %v61_v35 }
  0x21   :  { %280 = vmatprep.subr.mxu0 %v52_v36  ;;  %350 = vmatprep.subr.mxu1 %v54_v37  ;;  %p467_p9 = pnand %p466_p8, %p460_p5 }
  0x22   :  { %318 = vmatprep.mubr.f32.mxu0 %v104_v38  ;;  %388 = vmatprep.mubr.f32.mxu1 %v105_v39 }
  0x24   :  { %281 = vmatpush1.xpose.msra.mxu0 %v51_v40  ;;  %351 = vmatpush1.xpose.msra.mxu1 %v53_v41 }
  0x25   :  { %282 = vmatprep.subr.mxu0 %v44_v42  ;;  %352 = vmatprep.subr.mxu1 %v46_v43 }
  0x28   :  { %283 = vmatpush1.xpose.msra.mxu0 %v43_v44  ;;  %353 = vmatpush1.xpose.msra.mxu1 %v45_v45 }
  0x29   :  { %284 = vmatprep.subr.mxu0 %v36_v46  ;;  %354 = vmatprep.subr.mxu1 %v38_v47 }
  0x2c   :  { %285 = vmatpush1.xpose.msra.mxu0 %v35_v48  ;;  %355 = vmatpush1.xpose.msra.mxu1 %v37_v49 }
  0x2f   :  { %319 = vmatmul.mubr.f32.vlgmr.msra.gmra.mxu0 %v96_v31  ;;  %389 = vmatmul.mubr.f32.vlgmr.msra.gmra.mxu1 %v103_v33 }
  0xdf   :  { %v180_v50 = vpop.f32.mrf.mxu0  ;;  %v250_v51 = vpop.f32.mrf.mxu1 }
  0xe0   :  { %v181_v55 = vadd.f32 %v427_v54, %v180_v50 }
  0xe1   :  { %v182_v52 = vpop.f32.mrf.mxu0  ;;  %v252_v53 = vpop.f32.mrf.mxu1 }
  0xe2   :  { %v251_v56 = vadd.f32 %v250_v51, %v181_v55 }
  0xef   :  { %v320_v57 = vpop.f32.mrf.mxu0  ;;  %v390_v58 = vpop.f32.mrf.mxu1 }
  0xf0   :  { %v321_v59 = vadd.f32 %v320_v57, %v251_v56 }
  0xf1   :  { %v322_v60 = vpop.f32.mrf.mxu0  ;;  %v392_v61 = vpop.f32.mrf.mxu1 }
  0xf2   :  { %v391_v62 = vadd.f32 %v390_v58, %v321_v59 }
  0xf4   :  { %v394_v63 = vmul.f32 1000.0, %v391_v62 }
  0xf6   :  { %v395_v0 = vmin.f32 %v394_v63, 20.0  ;;  %vm408_vm2 = vcmp.gt.f32.partialorder %v394_v63, 20.0 }
  0xf8   :  { %v396_v1 = vmul.f32 1.442695, %v395_v0 }
  0xfa   :  { %435 = vpow2.f32 %v396_v1 }
 0x107   :  { %v436_v2 = vpop.eup %435 }
 0x108   :  { %v398_v3 = vadd.f32 1.0, %v436_v2  ;;  %v401_v4 = vmul.f32 -0.5, %v436_v2  ;;  %v404_v6 = vand.u32 2147483647, %v436_v2 }
 0x10a   :  { %437 = vlog2.f32 %v398_v3  ;;  %v402_v5 = vadd.f32 1.0, %v401_v4  ;;  %vm405_vm0 = vcmp.lt.f32.partialorder %v404_v6, 0.0004427343 }
 0x10c   :  { %v403_v9 = vmul.f32 %v436_v2, %v402_v5 }
 0x117   :  { %v438_v7 = vpop.eup %437 }
 0x118   :  { %v400_v8 = vmul.f32 0.6931472, %v438_v7 }
 0x11a   :  { %v406_v10 = vsel %vm405_vm0, %v403_v9, %v400_v8 }
 0x11b   :  { %v407_v11 = vmul.f32 0.001, %v406_v10 }
 0x11d   :  { %v409_v12 = vsel %vm408_vm2, %v391_v62, %v407_v11 }
 0x11e   :  { %411 = vst.msk [vmem:[#allocation5] sm:$0x3] %vm410_vm1, %v409_v12 }
 0x11f   :  { %470 = shalt.err (!%p467_p9)
}
 0x120   :  { %421 = dma.vmem_to_hbm [thread:$0]  %s419_s23, 32, %s526_s3, [#allocation4]  }
 0x121   :  { %481 = dma.done.wait [#allocation4], 32  }
 0x122   :  { %482 = vsyncadd [#allocation4], 4294967264 }
 0x123   :  { %425 = vsyncpa [#allocation3], 1 }
 0x124   :  { %426 = vsyncpa [#allocation4], 1 }

</bundles_post_ra>
